<compile_context>
chip_gen: v7x
topology: tpu7x:2x2x1
jax: 0.10.0
libtpu: 0.0.40
codegen_flags: <defaults>
</compile_context>

<pallas_src>
import math

import numpy as np
import jax
import jax.numpy as jnp
from jax.experimental import pallas as pl
from jax.experimental.pallas import tpu as pltpu


# ----------------------------------------------------------------------------
# Deterministic host-side construction of the ToS2Grid projection (setup/glue).
# Mirrors e3nn.o3.ToS2Grid(lmax, (res_beta, res_alpha), 'integral'):
#   betas  = (i + 0.5) / res_beta * pi,   alphas = j / res_alpha * 2*pi
#   sha[a, m+lmax] = { sqrt(2) sin(|m| a),  1 (m=0),  sqrt(2) cos(m a) }
#   shb[m+lmax, b, l^2+l+m] = N_l^{|m|} P_l^{|m|}(cos beta_b)
# ----------------------------------------------------------------------------
def _assoc_legendre(lmax, x):
    """Associated Legendre P_l^m(x) (Condon-Shortley phase), 0 <= m <= l <= lmax."""
    x = np.asarray(x, dtype=np.float64)
    out = {}
    somx2 = np.sqrt(np.maximum(1.0 - x * x, 0.0))
    for m in range(lmax + 1):
        pmm = np.ones_like(x)
        if m > 0:
            fact = 1.0
            for _ in range(m):
                pmm = -pmm * fact * somx2
                fact += 2.0
        out[(m, m)] = pmm
        if m < lmax:
            out[(m + 1, m)] = x * (2 * m + 1) * pmm
        for l in range(m + 2, lmax + 1):
            out[(l, m)] = ((2 * l - 1) * x * out[(l - 1, m)]
                           - (l + m - 1) * out[(l - 2, m)]) / (l - m)
    return out


def build_s2grid_projection(lmax, res_beta, res_alpha, pack=8):
    """Returns (Q_big, shb, sha):
      Q_big : (pack*D, pack*D) f32 block-diagonal Gram matrix kron(I_pack, P P^T)
      shb   : (2*lmax+1, res_beta, D) f32   (pure-JAX reference check only)
      sha   : (res_alpha, 2*lmax+1)   f32   (pure-JAX reference check only)
    """
    D = (lmax + 1) ** 2
    M = 2 * lmax + 1
    betas = (np.arange(res_beta) + 0.5) / res_beta * math.pi
    alphas = np.arange(res_alpha) / res_alpha * 2.0 * math.pi

    # alpha (Fourier) part: sha[a, m+lmax]
    sha = np.zeros((res_alpha, M), dtype=np.float64)
    for m in range(-lmax, lmax + 1):
        if m < 0:
            sha[:, m + lmax] = math.sqrt(2.0) * np.sin(-m * alphas)
        elif m == 0:
            sha[:, lmax] = 1.0
        else:
            sha[:, m + lmax] = math.sqrt(2.0) * np.cos(m * alphas)

    # beta (Legendre) part: shb[m+lmax, b, i]
    plm = _assoc_legendre(lmax, np.cos(betas))
    shb = np.zeros((M, res_beta, D), dtype=np.float64)
    for l in range(lmax + 1):
        for m in range(-l, l + 1):
            am = abs(m)
            norm = math.sqrt((2 * l + 1) / (4.0 * math.pi)
                             * math.factorial(l - am) / math.factorial(l + am))
            i = l * l + l + m
            shb[m + lmax, :, i] = norm * plm[(l, am)]

    # combined projection P[i, b*res_alpha + a] = sum_m shb[m, b, i] * sha[a, m]
    P = np.einsum('mbi,am->iba', shb, sha).reshape(D, res_beta * res_alpha)
    Q = P @ P.T                                   # (D, D) Gram matrix, float64
    Q_big = np.kron(np.eye(pack), Q)              # lane-dense block-diagonal
    return (jnp.asarray(Q_big, dtype=jnp.float32),
            jnp.asarray(shb, dtype=jnp.float32),
            jnp.asarray(sha, dtype=jnp.float32))


# ----------------------------------------------------------------------------
# Pallas kernel: packed SH-space difference, block-diag Gram contraction (MXU),
# fused scalar reduction accumulated across the grid.
# ----------------------------------------------------------------------------
def grid_loss_kernel(x_ref, t_ref, q_ref, out_ref, acc_ref):
    # x_ref, t_ref: (Zt, W)   q_ref: (W, W)   out_ref, acc_ref: (1, 1)
    k = pl.program_id(0)

    @pl.when(k == 0)
    def _():
        acc_ref[...] = jnp.zeros_like(acc_ref)

    d = x_ref[...] - t_ref[...]                                        # (Zt, W)
    dq = jnp.dot(d, q_ref[...], preferred_element_type=jnp.float32)   # MXU
    acc_ref[...] += jnp.sum(d * dq, axis=(0, 1), keepdims=True)       # (1, 1)

    @pl.when(k == pl.num_programs(0) - 1)
    def _():
        out_ref[...] = acc_ref[...]


def grid_loss(inp, tgt, q_big, *, zt_hint=512):
    """loss = mean_B( sum_{C,grid} (ToS2Grid(inp) - ToS2Grid(tgt))^2 )."""
    B, C, D = inp.shape
    W = q_big.shape[0]
    pack = W // D
    assert pack * D == W
    Z = B * C

    x2 = inp.reshape(Z, D).astype(jnp.float32)
    t2 = tgt.reshape(Z, D).astype(jnp.float32)

    # Pack `pack` SH rows per lane-dense W-wide row.  Padded rows are zero in
    # BOTH operands -> zero diff -> zero loss contribution.
    n_packed = -(-Z // pack)
    pad = n_packed * pack - Z
    if pad:
        x2 = jnp.concatenate([x2, jnp.zeros((pad, D), x2.dtype)], axis=0)
        t2 = jnp.concatenate([t2, jnp.zeros((pad, D), t2.dtype)], axis=0)
    xp = x2.reshape(n_packed, W)   # row-major repack of contiguous data (free)
    tp = t2.reshape(n_packed, W)

    # Tile the packed-row axis as a pipelined reduction over the grid.
    if n_packed <= zt_hint:
        zt = n_packed                          # single block == full array dims
    else:
        zt = zt_hint
        assert zt % 8 == 0, "tile height must be a multiple of 8"
        n_tiles = -(-n_packed // zt)
        pad_rows = n_tiles * zt - n_packed
        if pad_rows:
            xp = jnp.concatenate([xp, jnp.zeros((pad_rows, W), xp.dtype)], axis=0)
            tp = jnp.concatenate([tp, jnp.zeros((pad_rows, W), tp.dtype)], axis=0)
    n_tiles = xp.shape[0] // zt

    # Fold the mean-over-batch 1/B into the tiny Gram matrix (outside the kernel).
    q_scaled = q_big * jnp.float32(1.0 / B)

    out = pl.pallas_call(
        grid_loss_kernel,
        out_shape=jax.ShapeDtypeStruct((1, 1), jnp.float32),
        grid=(n_tiles,),
        in_specs=[
            pl.BlockSpec((zt, W), lambda k: (k, 0)),
            pl.BlockSpec((zt, W), lambda k: (k, 0)),
            pl.BlockSpec((W, W), lambda k: (0, 0)),
        ],
        out_specs=pl.BlockSpec((1, 1), lambda k: (0, 0)),
        scratch_shapes=[pltpu.VMEM((1, 1), jnp.float32)],
        compiler_params=pltpu.CompilerParams(
            dimension_semantics=("arbitrary",)),
    )(xp, tp, q_scaled)
    return out[0, 0]


if __name__ == "__main__":
    lmax = 3
    res_beta, res_alpha = 100, 51      # hardcoded in GridLoss.__init__
    D = (lmax + 1) ** 2                # 16
    PACK = 8                           # 8 * 16 = 128-lane-wide packed rows

    q_big, shb, sha = build_s2grid_projection(lmax, res_beta, res_alpha, pack=PACK)

    # Plain-JAX reference mirroring the torch forward (two-stage einsums to the
    # full (beta, alpha) grid, squared error, sum over (C,beta,alpha), mean over B).
    def to_grid(x):
        t = jnp.einsum('mbi,zci->zcbm', shb, x)
        return jnp.einsum('am,zcbm->zcba', sha, t)

    def ref_loss(a, b):
        return jnp.mean(jnp.sum((to_grid(a) - to_grid(b)) ** 2, axis=(1, 2, 3)))

    key = jax.random.PRNGKey(0)
    k1, k2, k3, k4 = jax.random.split(key, 4)

    # Small case from the module spec: B=2, C=4 -> a single (1, 128) packed tile.
    B, C = 2, 4
    inp = jax.random.normal(k1, (B, C, D), dtype=jnp.float32)
    tgt = jax.random.normal(k2, (B, C, D), dtype=jnp.float32)
    loss = jax.block_until_ready(grid_loss(inp, tgt, q_big))
    ref = ref_loss(inp, tgt)
    assert jnp.allclose(loss, ref, rtol=2e-3, atol=1e-3), (float(loss), float(ref))

    # Larger stacked case exercising the tiled grid-reduction path (grid=(4,)).
    B2, C2 = 4, 64
    inp2 = jax.random.normal(k3, (B2, C2, D), dtype=jnp.float32)
    tgt2 = jax.random.normal(k4, (B2, C2, D), dtype=jnp.float32)
    loss2 = jax.block_until_ready(grid_loss(inp2, tgt2, q_big, zt_hint=8))
    ref2 = ref_loss(inp2, tgt2)
    assert jnp.allclose(loss2, ref2, rtol=2e-3, atol=1e-3), (float(loss2), float(ref2))

    print("KERNEL_OK")
</pallas_src>

<mosaic_0001>
module attributes {stable_mosaic.version = 11 : i64} {
  func.func @grid_loss_kernel(%arg0: i32, %arg1: memref<1x128xf32, #tpu.memory_space<vmem>>, %arg2: memref<1x128xf32, #tpu.memory_space<vmem>>, %arg3: memref<128x128xf32, #tpu.memory_space<vmem>>, %arg4: memref<1x1xf32, #tpu.memory_space<vmem>>, %arg5: memref<1x1xf32, #tpu.memory_space<vmem>>) attributes {dimension_semantics = [#tpu.dimension_semantics<arbitrary>], iteration_bounds = array<i64: 1>, scalar_prefetch = 0 : i64, scratch_operands = 1 : i64, tpu.core_type = #tpu.core_type<tc>, window_params = [{transform_indices = @transform_0, window_bounds = array<i64: 1, 128>}, {transform_indices = @transform_1, window_bounds = array<i64: 1, 128>}, {pipeline_mode = #tpu.pipeline_mode<synchronous>, transform_indices = @transform_2, window_bounds = array<i64: 128, 128>}, {pipeline_mode = #tpu.pipeline_mode<synchronous>, transform_indices = @transform_3, window_bounds = array<i64: 1, 1>}]} {
    %c0_i32 = arith.constant 0 : i32
    %0 = arith.cmpi eq, %arg0, %c0_i32 : i32
    %1 = arith.extui %0 : i1 to i32
    %c0_i32_0 = arith.constant 0 : i32
    %2 = arith.cmpi ne, %1, %c0_i32_0 : i32
    scf.if %2 {
      %cst_13 = arith.constant 0.000000e+00 : f32
      %20 = vector.broadcast %cst_13 : f32 to vector<1x1xf32>
      %c0_14 = arith.constant 0 : index
      %c0_15 = arith.constant 0 : index
      %21 = vector.load %arg5[%c0_14, %c0_15] : memref<1x1xf32, #tpu.memory_space<vmem>>, vector<1x1xf32>
      tpu.vector_store %arg5[%c0_14, %c0_15], %20 {strides = array<i32>} : memref<1x1xf32, #tpu.memory_space<vmem>>, vector<1x1xf32>,
    } else {
    }
    %c0 = arith.constant 0 : index
    %c0_1 = arith.constant 0 : index
    %3 = vector.load %arg1[%c0, %c0_1] : memref<1x128xf32, #tpu.memory_space<vmem>>, vector<1x128xf32>
    %c0_2 = arith.constant 0 : index
    %c0_3 = arith.constant 0 : index
    %4 = vector.load %arg2[%c0_2, %c0_3] : memref<1x128xf32, #tpu.memory_space<vmem>>, vector<1x128xf32>
    %5 = arith.subf %3, %4 : vector<1x128xf32>
    %c0_4 = arith.constant 0 : index
    %c0_5 = arith.constant 0 : index
    %6 = vector.load %arg3[%c0_4, %c0_5] : memref<128x128xf32, #tpu.memory_space<vmem>>, vector<128x128xf32>
    %cst = arith.constant dense<0.000000e+00> : vector<1x128xf32>
    %7 = tpu.matmul %5, %6, %cst {dimension_numbers = #tpu.dot_dimension_numbers<[1], [0], [0], [1], [0, 0, 1, 1], [], []>} : vector<1x128xf32>, vector<128x128xf32>, vector<1x128xf32> -> vector<1x128xf32>
    %c0_6 = arith.constant 0 : index
    %c0_7 = arith.constant 0 : index
    %8 = vector.load %arg5[%c0_6, %c0_7] : memref<1x1xf32, #tpu.memory_space<vmem>>, vector<1x1xf32>
    %9 = arith.mulf %5, %7 : vector<1x128xf32>
    %10 = vector.shape_cast %9 : vector<1x128xf32> to vector<1x1x128xf32>
    %cst_8 = arith.constant dense<0.000000e+00> : vector<1xf32>
    %11 = vector.multi_reduction <add>, %10, %cst_8 [1, 2] : vector<1x1x128xf32> to vector<1xf32>
    %12 = vector.shape_cast %11 : vector<1xf32> to vector<1x1x1xf32>
    %13 = vector.extract %12[0, 0, 0] : f32 from vector<1x1x1xf32>
    %14 = vector.broadcast %13 : f32 to vector<1x1xf32>
    %15 = arith.addf %8, %14 : vector<1x1xf32>
    %c0_9 = arith.constant 0 : index
    %c0_10 = arith.constant 0 : index
    %16 = vector.load %arg5[%c0_9, %c0_10] : memref<1x1xf32, #tpu.memory_space<vmem>>, vector<1x1xf32>
    tpu.vector_store %arg5[%c0_9, %c0_10], %15 {strides = array<i32>} : memref<1x1xf32, #tpu.memory_space<vmem>>, vector<1x1xf32>,
    %c0_i32_11 = arith.constant 0 : i32
    %17 = arith.cmpi eq, %arg0, %c0_i32_11 : i32
    %18 = arith.extui %17 : i1 to i32
    %c0_i32_12 = arith.constant 0 : i32
    %19 = arith.cmpi ne, %18, %c0_i32_12 : i32
    scf.if %19 {
      %c0_13 = arith.constant 0 : index
      %c0_14 = arith.constant 0 : index
      %20 = vector.load %arg5[%c0_13, %c0_14] : memref<1x1xf32, #tpu.memory_space<vmem>>, vector<1x1xf32>
      %c0_15 = arith.constant 0 : index
      %c0_16 = arith.constant 0 : index
      %21 = vector.load %arg4[%c0_15, %c0_16] : memref<1x1xf32, #tpu.memory_space<vmem>>, vector<1x1xf32>
      tpu.vector_store %arg4[%c0_15, %c0_16], %20 {strides = array<i32>} : memref<1x1xf32, #tpu.memory_space<vmem>>, vector<1x1xf32>,
    } else {
    }
    return
  }
  func.func @transform_0(%arg0: i32) -> (i32, i32) {
    %c0_i32 = arith.constant 0 : i32
    %c0_i32_0 = arith.constant 0 : i32
    return %arg0, %c0_i32 : i32, i32
  }
  func.func @transform_1(%arg0: i32) -> (i32, i32) {
    %c0_i32 = arith.constant 0 : i32
    %c0_i32_0 = arith.constant 0 : i32
    return %arg0, %c0_i32 : i32, i32
  }
  func.func @transform_2(%arg0: i32) -> (i32, i32) {
    %c0_i32 = arith.constant 0 : i32
    %c0_i32_0 = arith.constant 0 : i32
    %c0_i32_1 = arith.constant 0 : i32
    return %c0_i32, %c0_i32_0 : i32, i32
  }
  func.func @transform_3(%arg0: i32) -> (i32, i32) {
    %c0_i32 = arith.constant 0 : i32
    %c0_i32_0 = arith.constant 0 : i32
    %c0_i32_1 = arith.constant 0 : i32
    return %c0_i32, %c0_i32_0 : i32, i32
  }
}

</mosaic_0001>

<bundles_post_ra>
// kernel: tpu_custom_call.1
= control target key start
LH: loop header
LB: loop body
LE: loop exit
PB: predicated region body
PF: predicated region fallthrough
CT: control target
= control target key end

     0   :  { %8 = vsyncpa [#allocation4], 0  ;;  %s409_s0 = inlined_call_operand.hbm [shape: f32[1,128], index: 0, kind: input, shape index: {}]   ;;  %s410_s1 = inlined_call_operand.vmem [shape: f32[1,128], index: 1, kind: input, shape index: {}]   ;;  %s411_s2 = inlined_call_operand.hbm [shape: f32[128,128], index: 2, kind: input, shape index: {}]   ;;  %s412_s3 = inlined_call_operand.hbm [shape: f32[1,1], index: 3, kind: output, shape index: {}]  }
   0x1   :  { %9 = vsyncpa [#allocation7], 0 }
   0x2   :  { %10 = vsyncpa [#allocation5], 0  ;;  %s332_s12 = smov [#allocation3]   ;;  %s333_s14 = smov [#allocation6]  }
   0x3   :  { %s17_s13 = sshll.u32 %s332_s12, 4  ;;  %s28_s15 = sshll.u32 %s333_s14, 4  ;;  %s18_s13 = int_to_ptr.vmem [resolvable:$true] %s17_s13  ;;  %s360_s15 = int_to_ptr.vmem [resolvable:$true] %s28_s15 }
   0x4   :  { %s260_s18 = scalar_lea.hbm %s409_s0, 16 }
   0x5   :  { %p261_p0 = scmp.ne.s32.totalorder %s409_s0, %s260_s18  ;;  %p264_p1 = scmp.lt.u32.totalorder %s260_s18, %s409_s0 }
   0x7   :  { %p266_p2 = pnand %p264_p1, %p261_p0 }
   0x9   :  { %269 = shalt.err (!%p266_p2)
}
   0xa   :  { %s270_s23 = scalar_lea.vmem %s18_s13, 16  ;;  %s274_s24 = scalar_lea.vmem %s18_s13, 32 }
   0xb   :  { %p271_p3 = scmp.ne.s32.totalorder %s18_s13, %s270_s23  ;;  %p275_p4 = scmp.lt.s32.totalorder %s18_s13, %s18_s13 }
   0xc   :  { %p276_p5 = scmp.lt.s32.totalorder %s274_s24, %s270_s23 }
   0xe   :  { %p277_p6 = por %p276_p5, %p275_p4 }
  0x10   :  { %p278_p7 = pnand %p277_p6, %p271_p3 }
  0x12   :  { %281 = shalt.err (!%p278_p7)
}
  0x13   :  { %20 = dma.hbm_to_vmem [thread:$0]  %s409_s0, 16, %s18_s13, [#allocation4]  }
  0x14   :  { %s282_s29 = scalar_lea.hbm %s411_s2, 2048 }
  0x15   :  { %p283_p8 = scmp.ne.s32.totalorder %s411_s2, %s282_s29  ;;  %p286_p9 = scmp.lt.u32.totalorder %s282_s29, %s411_s2 }
  0x17   :  { %p288_p10 = pnand %p286_p9, %p283_p8 }
  0x19   :  { %291 = shalt.err (!%p288_p10)
}
  0x1a   :  { %s292_s7 = scalar_lea.vmem %s360_s15, 2048  ;;  %p297_p12 = scmp.lt.s32.totalorder %s360_s15, %s360_s15 }
  0x1b   :  { %p293_p11 = scmp.ne.s32.totalorder %s360_s15, %s292_s7  ;;  %p298_p13 = scmp.lt.s32.totalorder %s292_s7, %s292_s7 }
  0x1d   :  { %p299_p0 = por %p298_p13, %p297_p12 }
  0x1f   :  { %p300_p1 = pnand %p299_p0, %p293_p11 }
  0x21   :  { %303 = shalt.err (!%p300_p1)
}
  0x22   :  { %s334_s0 = smov 128   ;;  %s335_s8 = smov 8  }
  0x23   :  { %34 = dma.hbm_to_vmem [thread:$0]  %s411_s2, 2048, %s360_s15, [#allocation7], %s334_s0, %s334_s0, %s335_s8  }
  0x24   :  { %326 = dma.done.wait [#allocation4], 16  }
  0x25   :  { %327 = vsyncadd [#allocation4], 4294967280 }
  0x26   :  { %328 = dma.done.wait [#allocation7], 2048  }
  0x27   :  { %329 = vsyncadd [#allocation7], 4294965248  ;;  %vm45_vm0 = vcmask 0   ;;  %v336_v0 = vmov 0.0|0.0   ;;  %v337_v1 = vmov 0.0   ;;  %vm338_vm1 = vmmov 0  }
  0x28   :  { %226 = vmatprep.subr.bf16.mxu0 %v336_v0  ;;  %46 = vst.msk [vmem:[#allocation2] sm:$0x1] %vm45_vm0, %v337_v1  ;;  %223 = vmatprep.mubr.msk.f32.mxu0 %vm338_vm1, %v337_v1  ;;  %v50_v2 = vld [vmem:[#allocation6] sm:$0xff]  ;;  %v51_v3 = vld [vmem:[#allocation6 + $0x8] sm:$0xff]  ;;  %v52_v4 = vld [vmem:[#allocation6 + $0x10] sm:$0xff]  ;;  %vm138_vm2 = vcmask 1040384  }
  0x29   :  { %v227_v5 = vpack.c.bf16 %v51_v3, %v50_v2  ;;  %v53_v6 = vld [vmem:[#allocation6 + $0x18] sm:$0xff]  ;;  %v54_v8 = vld [vmem:[#allocation6 + $0x20] sm:$0xff]  ;;  %v55_v9 = vld [vmem:[#allocation6 + $0x28] sm:$0xff]  ;;  %s339_s12 = smov [#allocation8]  }
  0x2a   :  { %v230_v7 = vpack.c.bf16 %v53_v6, %v52_v4  ;;  %v233_v10 = vpack.c.bf16 %v55_v9, %v54_v8  ;;  %v56_v11 = vld [vmem:[#allocation6 + $0x30] sm:$0xff]  ;;  %v57_v12 = vld [vmem:[#allocation6 + $0x38] sm:$0xff]  ;;  %v58_v14 = vld [vmem:[#allocation6 + $0x40] sm:$0xff]  ;;  %s164_s13 = sshll.u32 %s339_s12, 4  ;;  %s165_s13 = int_to_ptr.vmem [resolvable:$true] %s164_s13 }
  0x2b   :  { %228 = vmatpush3.bf16.msra.mxu0 %v227_v5  ;;  %v236_v13 = vpack.c.bf16 %v57_v12, %v56_v11  ;;  %v59_v15 = vld [vmem:[#allocation6 + $0x48] sm:$0xff]  ;;  %v60_v17 = vld [vmem:[#allocation6 + $0x50] sm:$0xff]  ;;  %v61_v18 = vld [vmem:[#allocation6 + $0x58] sm:$0xff]  ;;  %s304_s14 = scalar_lea.vmem %s165_s13, 16  ;;  %s308_s15 = scalar_lea.vmem %s165_s13, 32 }
  0x2c   :  { %229 = vmatprep.subr.bf16.mxu0 %v336_v0  ;;  %v239_v16 = vpack.c.bf16 %v59_v15, %v58_v14  ;;  %v242_v19 = vpack.c.bf16 %v61_v18, %v60_v17  ;;  %v62_v20 = vld [vmem:[#allocation6 + $0x60] sm:$0xff]  ;;  %v63_v21 = vld [vmem:[#allocation6 + $0x68] sm:$0xff]  ;;  %v64_v23 = vld [vmem:[#allocation6 + $0x70] sm:$0xff]  ;;  %p305_p2 = scmp.ne.s32.totalorder %s165_s13, %s304_s14  ;;  %p309_p3 = scmp.lt.s32.totalorder %s165_s13, %s165_s13 }
  0x2d   :  { %v245_v22 = vpack.c.bf16 %v63_v21, %v62_v20  ;;  %v65_v24 = vld [vmem:[#allocation6 + $0x78] sm:$0xff]  ;;  %p310_p4 = scmp.lt.s32.totalorder %s308_s15, %s304_s14 }
  0x2e   :  { %v248_v25 = vpack.c.bf16 %v65_v24, %v64_v23  ;;  %v47_v26 = vld [vmem:[#allocation3] sm:$0x1]  ;;  %v48_v27 = vld [vmem:[%s410_s1] sm:$0x1] }
  0x2f   :  { %231 = vmatpush3.bf16.msra.mxu0 %v230_v7  ;;  %v49_v28 = vsub.f32 %v47_v26, %v48_v27  ;;  %v136_v40 = vld [vmem:[#allocation2] sm:$0x1]  ;;  %p311_p5 = por %p310_p4, %p309_p3 }
  0x30   :  { %232 = vmatprep.subr.bf16.mxu0 %v336_v0 }
  0x31   :  { %p312_p6 = pnand %p311_p5, %p305_p2 }
  0x33   :  { %234 = vmatpush3.bf16.msra.mxu0 %v233_v10 }
  0x34   :  { %235 = vmatprep.subr.bf16.mxu0 %v336_v0 }
  0x37   :  { %237 = vmatpush3.bf16.msra.mxu0 %v236_v13 }
  0x38   :  { %238 = vmatprep.subr.bf16.mxu0 %v336_v0 }
  0x3b   :  { %240 = vmatpush3.bf16.msra.mxu0 %v239_v16 }
  0x3c   :  { %241 = vmatprep.subr.bf16.mxu0 %v336_v0 }
  0x3f   :  { %243 = vmatpush3.bf16.msra.mxu0 %v242_v19 }
  0x40   :  { %244 = vmatprep.subr.bf16.mxu0 %v336_v0 }
  0x43   :  { %246 = vmatpush3.bf16.msra.mxu0 %v245_v22 }
  0x44   :  { %247 = vmatprep.subr.bf16.mxu0 %v336_v0 }
  0x47   :  { %249 = vmatpush3.bf16.msra.mxu0 %v248_v25 }
  0x4a   :  { %224 = vmatmul.mubr.f32.vlgmr.msra.gmra.mrb[0].mxu0 %v49_v28 }
 0x11d   :  { %v132_v29 = vpop.f32.mrb[0].mxu0 }
 0x11e   :  { %v137_v30 = vmul.f32 %v132_v29, %v49_v28  ;;  %v225_v31 = vpop.f32.mrb[1].mxu0 }
 0x120   :  { %v139_v32 = vsel %vm138_vm2, %v137_v30, 0.0 }
 0x121   :  { %140 = vadd.xlane.f32.xlu0 %v139_v32 }
 0x1ae   :  { %v141_v33 = vpop.xlane.xlu0 %140 }
 0x1af   :  { %v142_v34 = vrot.slane %v141_v33, 4 }
 0x1b1   :  { %v143_v35 = vadd.f32 %v142_v34, %v141_v33 }
 0x1b3   :  { %v144_v36 = vrot.slane %v143_v35, 2 }
 0x1b5   :  { %v145_v37 = vadd.f32 %v144_v36, %v143_v35 }
 0x1b7   :  { %v146_v38 = vrot.slane %v145_v37, 1 }
 0x1b9   :  { %v147_v39 = vadd.f32 %v146_v38, %v145_v37 }
 0x1bb   :  { %250 = vpush %v147_v39 }
 0x1ec   :  { %s251_s1 = spop %250 }
 0x1ed   :  { %v149_v41 = vstv %s251_s1 }
 0x1ee   :  { %v150_v42 = vadd.f32 %v149_v41, %v136_v40 }
 0x1f0   :  { %152 = vst.msk [vmem:[#allocation2] sm:$0x1] %vm45_vm0, %v150_v42 }
 0x1f7   :  { %v156_v43 = vld [vmem:[#allocation2] sm:$0x1] }
 0x1f8   :  { %157 = vst.msk [vmem:[#allocation8] sm:$0x1] %vm45_vm0, %v156_v43 }
 0x1f9   :  { %315 = shalt.err (!%p312_p6)
}
 0x1fa   :  { %s316_s18 = scalar_lea.hbm %s412_s3, 16 }
 0x1fb   :  { %p317_p7 = scmp.ne.s32.totalorder %s412_s3, %s316_s18  ;;  %p320_p8 = scmp.lt.u32.totalorder %s316_s18, %s412_s3 }
 0x1fd   :  { %p322_p9 = pnand %p320_p8, %p317_p7 }
 0x1ff   :  { %325 = shalt.err (!%p322_p9)
}
 0x200   :  { %167 = dma.vmem_to_hbm [thread:$0]  %s165_s13, 16, %s412_s3, [#allocation5]  }
 0x201   :  { %330 = dma.done.wait [#allocation5], 16  }
 0x202   :  { %331 = vsyncadd [#allocation5], 4294967280 }
 0x203   :  { %171 = vsyncpa [#allocation4], 1 }
 0x204   :  { %172 = vsyncpa [#allocation7], 1 }
 0x205   :  { %173 = vsyncpa [#allocation5], 1 }

</bundles_post_ra>
